<compile_context>
chip_gen: v5e
topology: v5e:2x2
jax: 0.10.0
libtpu: 0.0.40
codegen_flags: <defaults>
</compile_context>

<pallas_src>
import jax
import jax.numpy as jnp
from jax.experimental import pallas as pl
from jax.experimental.pallas import tpu as pltpu

LANE = 128


def _round_up(n, m):
    return ((n + m - 1) // m) * m


def _pad_to(a, shape):
    return jnp.pad(a, [(0, t - s) for s, t in zip(a.shape, shape)])


def mlp_kernel(x_ref,
               w1_ref, b1_ref,
               w2_ref, b2_ref,
               w3_ref, b3_ref,
               w4_ref, b4_ref,
               o_ref):
    bf16 = jnp.bfloat16

    h = jnp.dot(x_ref[...], w1_ref[...],
                preferred_element_type=jnp.float32) + b1_ref[...]
    h = jax.nn.sigmoid(h)                                   # f32 activations

    h = jnp.dot(h.astype(bf16), w2_ref[...],
                preferred_element_type=jnp.float32) + b2_ref[...]
    h = jax.nn.sigmoid(h)

    h = jnp.dot(h.astype(bf16), w3_ref[...],
                preferred_element_type=jnp.float32) + b3_ref[...]
    h = jax.nn.sigmoid(h)

    out = jnp.dot(h.astype(bf16), w4_ref[...],
                  preferred_element_type=jnp.float32) + b4_ref[...]
    o_ref[...] = out.astype(o_ref.dtype)


def neural_net_forward(x, params, *, batch_tile=256):
    """x: (B, num_features) f32.  params: w_i shaped (in, out) (== W.T of the
    torch Linear), b_i shaped (1, out), all f32.  Returns (B, num_classes) f32."""
    B, F = x.shape
    w1, b1 = params["w1"], params["b1"]
    w2, b2 = params["w2"], params["b2"]
    w3, b3 = params["w3"], params["b3"]
    w4, b4 = params["w4"], params["b4"]
    num_classes = w4.shape[1]

    # Lane-dense padded widths for every output/hidden dimension.
    h0p = _round_up(w1.shape[1], LANE)
    h1p = _round_up(w2.shape[1], LANE)
    h2p = _round_up(w3.shape[1], LANE)
    ncp = _round_up(num_classes, LANE)

    bf16 = jnp.bfloat16
    # Zero-padded weight rows guarantee padded activation lanes (sigmoid(0)=0.5)
    # contribute nothing to the next layer.
    w1p = _pad_to(w1, (F, h0p)).astype(bf16)
    w2p = _pad_to(w2, (h0p, h1p)).astype(bf16)
    w3p = _pad_to(w3, (h1p, h2p)).astype(bf16)
    w4p = _pad_to(w4, (h2p, ncp)).astype(bf16)
    b1p = _pad_to(b1, (1, h0p)).astype(jnp.float32)
    b2p = _pad_to(b2, (1, h1p)).astype(jnp.float32)
    b3p = _pad_to(b3, (1, h2p)).astype(jnp.float32)
    b4p = _pad_to(b4, (1, ncp)).astype(jnp.float32)

    # Batch tile: big for throughput, rounded to a multiple of 8 sublanes,
    # shrunk for tiny batches.  Batch is zero-padded so ragged B works.
    bm = _round_up(min(batch_tile, B), 8)
    B_pad = _round_up(B, bm)
    grid = (B_pad // bm,)

    xp = _pad_to(x, (B_pad, F)).astype(bf16)

    def full(shape):
        return pl.BlockSpec(shape, lambda i: (0,) * len(shape))

    in_specs = [
        pl.BlockSpec((bm, F), lambda i: (i, 0)),
        full(w1p.shape), full(b1p.shape),
        full(w2p.shape), full(b2p.shape),
        full(w3p.shape), full(b3p.shape),
        full(w4p.shape), full(b4p.shape),
    ]
    out_spec = pl.BlockSpec((bm, ncp), lambda i: (i, 0))

    flops = 2 * B_pad * (F * h0p + h0p * h1p + h1p * h2p + h2p * ncp)
    transcendentals = B_pad * (h0p + h1p + h2p)
    bytes_accessed = (
        xp.size * 2
        + (w1p.size + w2p.size + w3p.size + w4p.size) * 2
        + (b1p.size + b2p.size + b3p.size + b4p.size) * 4
        + B_pad * ncp * 4)

    out_padded = pl.pallas_call(
        mlp_kernel,
        out_shape=jax.ShapeDtypeStruct((B_pad, ncp), jnp.float32),
        grid=grid,
        in_specs=in_specs,
        out_specs=out_spec,
        compiler_params=pltpu.CompilerParams(
            dimension_semantics=("parallel",),
            vmem_limit_bytes=64 << 20),
        cost_estimate=pl.CostEstimate(
            flops=flops,
            transcendentals=transcendentals,
            bytes_accessed=bytes_accessed),
    )(xp, w1p, b1p, w2p, b2p, w3p, b3p, w4p, b4p)

    return out_padded[:B, :num_classes]


def init_params(key, input_size, hidden_sizes, num_classes):
    """Mimics nn.Linear's U(-1/sqrt(fan_in), 1/sqrt(fan_in)) init.
    Weights stored as (in, out) == W.T so the kernel computes x @ W + b."""
    sizes = [input_size] + list(hidden_sizes) + [num_classes]
    params = {}
    for idx in range(4):
        fan_in, fan_out = sizes[idx], sizes[idx + 1]
        key, kw, kb = jax.random.split(key, 3)
        bound = 1.0 / jnp.sqrt(float(fan_in))
        params[f"w{idx+1}"] = jax.random.uniform(
            kw, (fan_in, fan_out), jnp.float32, -bound, bound)
        params[f"b{idx+1}"] = jax.random.uniform(
            kb, (1, fan_out), jnp.float32, -bound, bound)
    return params


def reference_forward(x, params):
    h = jax.nn.sigmoid(x @ params["w1"] + params["b1"])
    h = jax.nn.sigmoid(h @ params["w2"] + params["b2"])
    h = jax.nn.sigmoid(h @ params["w3"] + params["b3"])
    return h @ params["w4"] + params["b4"]


if __name__ == "__main__":
    num_features = 784
    hidden_sizes = [128, 64, 32]
    num_classes = 10
    batch = 8  # small, deliberately not a multiple of the default tile

    key = jax.random.PRNGKey(0)
    key, kx = jax.random.split(key)
    x = jax.random.normal(kx, (batch, num_features), jnp.float32)
    params = init_params(key, num_features, hidden_sizes, num_classes)

    out = neural_net_forward(x, params)
    out = jax.block_until_ready(out)

    ref = reference_forward(x, params)
    assert out.shape == (batch, num_classes), out.shape
    # bf16 matmul operands with f32 accumulation => small deviation vs f32 ref.
    assert jnp.allclose(out, ref, atol=2e-2, rtol=2e-2), (
        "mismatch vs reference: max abs diff = %f"
        % float(jnp.max(jnp.abs(out - ref))))

    print("KERNEL_OK")
</pallas_src>

<mosaic_0001>
module attributes {stable_mosaic.version = 11 : i64} {
  func.func @mlp_kernel(%arg0: i32, %arg1: memref<8x784xbf16, #tpu.memory_space<vmem>>, %arg2: memref<784x128xbf16, #tpu.memory_space<vmem>>, %arg3: memref<1x128xf32, #tpu.memory_space<vmem>>, %arg4: memref<128x128xbf16, #tpu.memory_space<vmem>>, %arg5: memref<1x128xf32, #tpu.memory_space<vmem>>, %arg6: memref<128x128xbf16, #tpu.memory_space<vmem>>, %arg7: memref<1x128xf32, #tpu.memory_space<vmem>>, %arg8: memref<128x128xbf16, #tpu.memory_space<vmem>>, %arg9: memref<1x128xf32, #tpu.memory_space<vmem>>, %arg10: memref<8x128xf32, #tpu.memory_space<vmem>>) attributes {dimension_semantics = [#tpu.dimension_semantics<parallel>], iteration_bounds = array<i64: 1>, scalar_prefetch = 0 : i64, scratch_operands = 0 : i64, tpu.core_type = #tpu.core_type<tc>, window_params = [{transform_indices = @transform_0, window_bounds = array<i64: 8, 784>}, {pipeline_mode = #tpu.pipeline_mode<synchronous>, transform_indices = @transform_1, window_bounds = array<i64: 784, 128>}, {pipeline_mode = #tpu.pipeline_mode<synchronous>, transform_indices = @transform_2, window_bounds = array<i64: 1, 128>}, {pipeline_mode = #tpu.pipeline_mode<synchronous>, transform_indices = @transform_3, window_bounds = array<i64: 128, 128>}, {pipeline_mode = #tpu.pipeline_mode<synchronous>, transform_indices = @transform_4, window_bounds = array<i64: 1, 128>}, {pipeline_mode = #tpu.pipeline_mode<synchronous>, transform_indices = @transform_5, window_bounds = array<i64: 128, 128>}, {pipeline_mode = #tpu.pipeline_mode<synchronous>, transform_indices = @transform_6, window_bounds = array<i64: 1, 128>}, {pipeline_mode = #tpu.pipeline_mode<synchronous>, transform_indices = @transform_7, window_bounds = array<i64: 128, 128>}, {pipeline_mode = #tpu.pipeline_mode<synchronous>, transform_indices = @transform_8, window_bounds = array<i64: 1, 128>}, {transform_indices = @transform_9, window_bounds = array<i64: 8, 128>}]} {
    %c0 = arith.constant 0 : index
    %c0_0 = arith.constant 0 : index
    %0 = vector.load %arg1[%c0, %c0_0] : memref<8x784xbf16, #tpu.memory_space<vmem>>, vector<8x784xbf16>
    %c0_1 = arith.constant 0 : index
    %c0_2 = arith.constant 0 : index
    %1 = vector.load %arg2[%c0_1, %c0_2] : memref<784x128xbf16, #tpu.memory_space<vmem>>, vector<784x128xbf16>
    %cst = arith.constant dense<0.000000e+00> : vector<8x128xf32>
    %2 = tpu.matmul %0, %1, %cst {dimension_numbers = #tpu.dot_dimension_numbers<[1], [0], [0], [1], [0, 0, 1, 1], [], []>} : vector<8x784xbf16>, vector<784x128xbf16>, vector<8x128xf32> -> vector<8x128xf32>
    %c0_3 = arith.constant 0 : index
    %c0_4 = arith.constant 0 : index
    %3 = vector.load %arg3[%c0_3, %c0_4] : memref<1x128xf32, #tpu.memory_space<vmem>>, vector<1x128xf32>
    %4 = vector.broadcast %3 : vector<1x128xf32> to vector<8x128xf32>
    %5 = arith.addf %2, %4 : vector<8x128xf32>
    %6 = arith.negf %5 : vector<8x128xf32>
    %7 = math.exp %6 : vector<8x128xf32>
    %cst_5 = arith.constant 1.000000e+00 : f32
    %8 = vector.broadcast %cst_5 : f32 to vector<8x128xf32>
    %9 = arith.addf %8, %7 : vector<8x128xf32>
    %10 = arith.divf %8, %9 : vector<8x128xf32>
    %11 = arith.truncf %10 : vector<8x128xf32> to vector<8x128xbf16>
    %c0_6 = arith.constant 0 : index
    %c0_7 = arith.constant 0 : index
    %12 = vector.load %arg4[%c0_6, %c0_7] : memref<128x128xbf16, #tpu.memory_space<vmem>>, vector<128x128xbf16>
    %cst_8 = arith.constant dense<0.000000e+00> : vector<8x128xf32>
    %13 = tpu.matmul %11, %12, %cst_8 {dimension_numbers = #tpu.dot_dimension_numbers<[1], [0], [0], [1], [0, 0, 1, 1], [], []>} : vector<8x128xbf16>, vector<128x128xbf16>, vector<8x128xf32> -> vector<8x128xf32>
    %c0_9 = arith.constant 0 : index
    %c0_10 = arith.constant 0 : index
    %14 = vector.load %arg5[%c0_9, %c0_10] : memref<1x128xf32, #tpu.memory_space<vmem>>, vector<1x128xf32>
    %15 = vector.broadcast %14 : vector<1x128xf32> to vector<8x128xf32>
    %16 = arith.addf %13, %15 : vector<8x128xf32>
    %17 = arith.negf %16 : vector<8x128xf32>
    %18 = math.exp %17 : vector<8x128xf32>
    %cst_11 = arith.constant 1.000000e+00 : f32
    %19 = vector.broadcast %cst_11 : f32 to vector<8x128xf32>
    %20 = arith.addf %19, %18 : vector<8x128xf32>
    %21 = arith.divf %19, %20 : vector<8x128xf32>
    %22 = arith.truncf %21 : vector<8x128xf32> to vector<8x128xbf16>
    %c0_12 = arith.constant 0 : index
    %c0_13 = arith.constant 0 : index
    %23 = vector.load %arg6[%c0_12, %c0_13] : memref<128x128xbf16, #tpu.memory_space<vmem>>, vector<128x128xbf16>
    %cst_14 = arith.constant dense<0.000000e+00> : vector<8x128xf32>
    %24 = tpu.matmul %22, %23, %cst_14 {dimension_numbers = #tpu.dot_dimension_numbers<[1], [0], [0], [1], [0, 0, 1, 1], [], []>} : vector<8x128xbf16>, vector<128x128xbf16>, vector<8x128xf32> -> vector<8x128xf32>
    %c0_15 = arith.constant 0 : index
    %c0_16 = arith.constant 0 : index
    %25 = vector.load %arg7[%c0_15, %c0_16] : memref<1x128xf32, #tpu.memory_space<vmem>>, vector<1x128xf32>
    %26 = vector.broadcast %25 : vector<1x128xf32> to vector<8x128xf32>
    %27 = arith.addf %24, %26 : vector<8x128xf32>
    %28 = arith.negf %27 : vector<8x128xf32>
    %29 = math.exp %28 : vector<8x128xf32>
    %cst_17 = arith.constant 1.000000e+00 : f32
    %30 = vector.broadcast %cst_17 : f32 to vector<8x128xf32>
    %31 = arith.addf %30, %29 : vector<8x128xf32>
    %32 = arith.divf %30, %31 : vector<8x128xf32>
    %33 = arith.truncf %32 : vector<8x128xf32> to vector<8x128xbf16>
    %c0_18 = arith.constant 0 : index
    %c0_19 = arith.constant 0 : index
    %34 = vector.load %arg8[%c0_18, %c0_19] : memref<128x128xbf16, #tpu.memory_space<vmem>>, vector<128x128xbf16>
    %cst_20 = arith.constant dense<0.000000e+00> : vector<8x128xf32>
    %35 = tpu.matmul %33, %34, %cst_20 {dimension_numbers = #tpu.dot_dimension_numbers<[1], [0], [0], [1], [0, 0, 1, 1], [], []>} : vector<8x128xbf16>, vector<128x128xbf16>, vector<8x128xf32> -> vector<8x128xf32>
    %c0_21 = arith.constant 0 : index
    %c0_22 = arith.constant 0 : index
    %36 = vector.load %arg9[%c0_21, %c0_22] : memref<1x128xf32, #tpu.memory_space<vmem>>, vector<1x128xf32>
    %37 = vector.broadcast %36 : vector<1x128xf32> to vector<8x128xf32>
    %38 = arith.addf %35, %37 : vector<8x128xf32>
    %c0_23 = arith.constant 0 : index
    %c0_24 = arith.constant 0 : index
    %39 = vector.load %arg10[%c0_23, %c0_24] : memref<8x128xf32, #tpu.memory_space<vmem>>, vector<8x128xf32>
    tpu.vector_store %arg10[%c0_23, %c0_24], %38 {strides = array<i32>} : memref<8x128xf32, #tpu.memory_space<vmem>>, vector<8x128xf32>,
    return
  }
  func.func @transform_0(%arg0: i32) -> (i32, i32) {
    %c0_i32 = arith.constant 0 : i32
    %c0_i32_0 = arith.constant 0 : i32
    return %arg0, %c0_i32 : i32, i32
  }
  func.func @transform_1(%arg0: i32) -> (i32, i32) {
    %c0_i32 = arith.constant 0 : i32
    %c0_i32_0 = arith.constant 0 : i32
    %c0_i32_1 = arith.constant 0 : i32
    return %c0_i32, %c0_i32_0 : i32, i32
  }
  func.func @transform_2(%arg0: i32) -> (i32, i32) {
    %c0_i32 = arith.constant 0 : i32
    %c0_i32_0 = arith.constant 0 : i32
    %c0_i32_1 = arith.constant 0 : i32
    return %c0_i32, %c0_i32_0 : i32, i32
  }
  func.func @transform_3(%arg0: i32) -> (i32, i32) {
    %c0_i32 = arith.constant 0 : i32
    %c0_i32_0 = arith.constant 0 : i32
    %c0_i32_1 = arith.constant 0 : i32
    return %c0_i32, %c0_i32_0 : i32, i32
  }
  func.func @transform_4(%arg0: i32) -> (i32, i32) {
    %c0_i32 = arith.constant 0 : i32
    %c0_i32_0 = arith.constant 0 : i32
    %c0_i32_1 = arith.constant 0 : i32
    return %c0_i32, %c0_i32_0 : i32, i32
  }
  func.func @transform_5(%arg0: i32) -> (i32, i32) {
    %c0_i32 = arith.constant 0 : i32
    %c0_i32_0 = arith.constant 0 : i32
    %c0_i32_1 = arith.constant 0 : i32
    return %c0_i32, %c0_i32_0 : i32, i32
  }
  func.func @transform_6(%arg0: i32) -> (i32, i32) {
    %c0_i32 = arith.constant 0 : i32
    %c0_i32_0 = arith.constant 0 : i32
    %c0_i32_1 = arith.constant 0 : i32
    return %c0_i32, %c0_i32_0 : i32, i32
  }
  func.func @transform_7(%arg0: i32) -> (i32, i32) {
    %c0_i32 = arith.constant 0 : i32
    %c0_i32_0 = arith.constant 0 : i32
    %c0_i32_1 = arith.constant 0 : i32
    return %c0_i32, %c0_i32_0 : i32, i32
  }
  func.func @transform_8(%arg0: i32) -> (i32, i32) {
    %c0_i32 = arith.constant 0 : i32
    %c0_i32_0 = arith.constant 0 : i32
    %c0_i32_1 = arith.constant 0 : i32
    return %c0_i32, %c0_i32_0 : i32, i32
  }
  func.func @transform_9(%arg0: i32) -> (i32, i32) {
    %c0_i32 = arith.constant 0 : i32
    %c0_i32_0 = arith.constant 0 : i32
    return %arg0, %c0_i32 : i32, i32
  }
}

</mosaic_0001>

<bundles_post_ra>
// kernel: tpu_custom_call.1
= control target key start
LH: loop header
LB: loop body
LE: loop exit
PB: predicated region body
PF: predicated region fallthrough
CT: control target
= control target key end

     0   :  { %14 = vsyncpa [#allocation3], 0  ;;  %s1585_s0 = inlined_call_operand.hbm [shape: bf16[8,784], index: 0, kind: input, shape index: {}]   ;;  %s1586_s1 = inlined_call_operand.hbm [shape: bf16[784,128], index: 1, kind: input, shape index: {}]   ;;  %s1587_s2 = inlined_call_operand.vmem [shape: f32[1,128], index: 2, kind: input, shape index: {}]   ;;  %s1588_s3 = inlined_call_operand.hbm [shape: bf16[128,128], index: 3, kind: input, shape index: {}]   ;;  %s1589_s4 = inlined_call_operand.vmem [shape: f32[1,128], index: 4, kind: input, shape index: {}]   ;;  %s1590_s5 = inlined_call_operand.hbm [shape: bf16[128,128], index: 5, kind: input, shape index: {}]   ;;  %s1591_s6 = inlined_call_operand.vmem [shape: f32[1,128], index: 6, kind: input, shape index: {}]   ;;  %s1592_s7 = inlined_call_operand.hbm [shape: bf16[128,128], index: 7, kind: input, shape index: {}]   ;;  %s1593_s8 = inlined_call_operand.vmem [shape: f32[1,128], index: 8, kind: input, shape index: {}]   ;;  %s1594_s9 = inlined_call_operand.hbm [shape: f32[8,128], index: 9, kind: output, shape index: {}]  }
   0x1   :  { %15 = vsyncpa [#allocation6], 0 }
   0x2   :  { %16 = vsyncpa [#allocation9], 0  ;;  %s33_s11 = sshll.u32 %s1586_s1, 4  ;;  %s34_s11 = int_to_ptr.hbm [resolvable:$true] %s33_s11 }
   0x3   :  { %17 = vsyncpa [#allocation4], 0  ;;  %s1497_s12 = smov [#allocation5]   ;;  %s63_s16 = sshll.u32 %s1590_s5, 4  ;;  %s64_s16 = int_to_ptr.hbm [resolvable:$true] %s63_s16 }
   0x4   :  { %s35_s13 = sshll.u32 %s1497_s12, 4  ;;  %s1498_s17 = smov 64   ;;  %s36_s13 = int_to_ptr.vmem [resolvable:$true] %s35_s13 }
   0x5   :  { %s1499_s18 = smov 4   ;;  %s1500_s19 = smov [#allocation8]  }
   0x6   :  { %41 = dma.hbm_to_vmem [thread:$0]  %s34_s11, 6272, %s36_s13, [#allocation6], %s1498_s17, %s1498_s17, %s1499_s18  }
   0x7   :  { %s65_s20 = sshll.u32 %s1500_s19, 4  ;;  %s23_s23 = sshll.u32 %s1585_s0, 4  ;;  %s66_s20 = int_to_ptr.vmem [resolvable:$true] %s65_s20  ;;  %s24_s23 = int_to_ptr.hbm [resolvable:$true] %s23_s23 }
   0x8   :  { %71 = dma.hbm_to_vmem [thread:$0]  %s64_s16, 1024, %s66_s20, [#allocation9], %s1498_s17, %s1498_s17, %s1499_s18  }
   0x9   :  { %s48_s25 = sshll.u32 %s1588_s3, 4  ;;  %s1501_s26 = smov [#allocation2]   ;;  %s49_s25 = int_to_ptr.hbm [resolvable:$true] %s48_s25 }
   0xa   :  { %s25_s27 = sshll.u32 %s1501_s26, 4  ;;  %s1502_s5 = smov [#allocation7]   ;;  %s26_s27 = int_to_ptr.vmem [resolvable:$true] %s25_s27 }
   0xb   :  { %28 = dma.hbm_to_vmem [thread:$0]  %s24_s23, 448, %s26_s27, [#allocation3]  }
   0xc   :  { %s50_s28 = sshll.u32 %s1502_s5, 4  ;;  %s78_s10 = sshll.u32 %s1592_s7, 4  ;;  %s51_s28 = int_to_ptr.vmem [resolvable:$true] %s50_s28  ;;  %s79_s10 = int_to_ptr.hbm [resolvable:$true] %s78_s10 }
   0xd   :  { %56 = dma.hbm_to_vmem [thread:$0]  %s49_s25, 1024, %s51_s28, [#allocation6], %s1498_s17, %s1498_s17, %s1499_s18  }
   0xe   :  { %s1503_s0 = smov [#allocation10]  }
   0xf   :  { %s80_s11 = sshll.u32 %s1503_s0, 4  ;;  %s81_s11 = int_to_ptr.vmem [resolvable:$true] %s80_s11 }
  0x10   :  { %86 = dma.hbm_to_vmem [thread:$0]  %s79_s10, 1024, %s81_s11, [#allocation9], %s1498_s17, %s1498_s17, %s1499_s18  }
  0x11   :  { %1489 = dma.done.wait [#allocation3], 448  }
  0x12   :  { %1490 = vsyncadd [#allocation3], 4294966848 }
  0x13   :  { %1491 = dma.done.wait [#allocation6], 7296  }
  0x14   :  { %1492 = vsyncadd [#allocation6], 4294960000 }
  0x15   :  { %1493 = dma.done.wait [#allocation9], 2048  }
  0x16   :  { %1494 = vsyncadd [#allocation9], 4294965248  ;;  %v1255_v0 = vld [vmem:[#allocation5 + $0x38] sm:$0xff]  ;;  %v1254_v3 = vld [vmem:[#allocation5 + $0x30] sm:$0xff]  ;;  %vm534_vm0 = vcmask 130048   ;;  %s1504_s15 = smov [#allocation11]  }
  0x17   :  { %v1263_v1 = vld [vmem:[#allocation5 + $0x78] sm:$0xff]  ;;  %538 = vmatpush.bf16.msra.mxu0 %v1255_v0  ;;  %v1262_v4 = vld [vmem:[#allocation5 + $0x70] sm:$0xff]  ;;  %v1253_v8 = vld [vmem:[#allocation5 + $0x28] sm:$0xff]  ;;  %s938_s16 = sshll.u32 %s1504_s15, 4  ;;  %s940_s19 = sshll.u32 %s1594_s9, 4  ;;  %s939_s16 = int_to_ptr.vmem [resolvable:$true] %s938_s16  ;;  %s941_s19 = int_to_ptr.hbm [resolvable:$true] %s940_s19 }
  0x18   :  { %v1271_v2 = vld [vmem:[#allocation5 + $0xb8] sm:$0xff]  ;;  %551 = vmatpush.bf16.msra.mxu1 %v1263_v1  ;;  %v1270_v5 = vld [vmem:[#allocation5 + $0xb0] sm:$0xff]  ;;  %v1261_v9 = vld [vmem:[#allocation5 + $0x68] sm:$0xff] }
  0x19   :  { %564 = vmatpush.bf16.msra.mxu2 %v1271_v2  ;;  %v1279_v6 = vld [vmem:[#allocation5 + $0xf8] sm:$0xff]  ;;  %v1278_v7 = vld [vmem:[#allocation5 + $0xf0] sm:$0xff]  ;;  %v1269_v10 = vld [vmem:[#allocation5 + $0xa8] sm:$0xff] }
  0x1a   :  { %577 = vmatpush.bf16.msra.mxu3 %v1279_v6  ;;  %v1277_v11 = vld [vmem:[#allocation5 + $0xe8] sm:$0xff]  ;;  %v1252_v12 = vld [vmem:[#allocation5 + $0x20] sm:$0xff]  ;;  %v1251_v16 = vld [vmem:[#allocation5 + $0x18] sm:$0xff] }
  0x1b   :  { %539 = vmatpush.bf16.msra.mxu0 %v1254_v3  ;;  %v1260_v13 = vld [vmem:[#allocation5 + $0x60] sm:$0xff]  ;;  %v1259_v17 = vld [vmem:[#allocation5 + $0x58] sm:$0xff]  ;;  %v1250_v20 = vld [vmem:[#allocation5 + $0x10] sm:$0xff] }
  0x1c   :  { %552 = vmatpush.bf16.msra.mxu1 %v1262_v4  ;;  %v1268_v14 = vld [vmem:[#allocation5 + $0xa0] sm:$0xff]  ;;  %v1267_v18 = vld [vmem:[#allocation5 + $0x98] sm:$0xff]  ;;  %v1258_v21 = vld [vmem:[#allocation5 + $0x50] sm:$0xff] }
  0x1d   :  { %565 = vmatpush.bf16.msra.mxu2 %v1270_v5  ;;  %v1276_v15 = vld [vmem:[#allocation5 + $0xe0] sm:$0xff]  ;;  %v1275_v19 = vld [vmem:[#allocation5 + $0xd8] sm:$0xff]  ;;  %v1266_v22 = vld [vmem:[#allocation5 + $0x90] sm:$0xff] }
  0x1e   :  { %578 = vmatpush.bf16.msra.mxu3 %v1278_v7  ;;  %v1274_v23 = vld [vmem:[#allocation5 + $0xd0] sm:$0xff]  ;;  %v1249_v24 = vld [vmem:[#allocation5 + $0x8] sm:$0xff]  ;;  %v1248_v32 = vld [vmem:[#allocation5] sm:$0xff] }
  0x1f   :  { %540 = vmatpush.bf16.msra.mxu0 %v1253_v8  ;;  %v1257_v25 = vld [vmem:[#allocation5 + $0x48] sm:$0xff]  ;;  %v1256_v33 = vld [vmem:[#allocation5 + $0x40] sm:$0xff]  ;;  %v1287_v34 = vld [vmem:[#allocation5 + $0x138] sm:$0xff] }
  0x20   :  { %553 = vmatpush.bf16.msra.mxu1 %v1261_v9  ;;  %v110_v26 = vld [vmem:[#allocation2] sm:$0xff]  ;;  %v111_v28 = vld [vmem:[#allocation2 + $0x8] sm:$0xff]  ;;  %v1295_v35 = vld [vmem:[#allocation5 + $0x178] sm:$0xff] }
  0x21   :  { %566 = vmatpush.bf16.msra.mxu2 %v1269_v10  ;;  %v1265_v27 = vld [vmem:[#allocation5 + $0x88] sm:$0xff]  ;;  %v220_v29 = vunpack.c.l.b16 %v110_v26  ;;  %v221_v31 = vunpack.c.h.b16 %v110_v26  ;;  %v1264_v36 = vld [vmem:[#allocation5 + $0x80] sm:$0xff]  ;;  %v222_v37 = vunpack.c.l.b16 %v111_v28  ;;  %v223_v40 = vunpack.c.h.b16 %v111_v28  ;;  %v1286_v43 = vld [vmem:[#allocation5 + $0x130] sm:$0xff] }
  0x22   :  { %579 = vmatpush.bf16.msra.mxu3 %v1277_v11  ;;  %v1273_v30 = vld [vmem:[#allocation5 + $0xc8] sm:$0xff]  ;;  %v1272_v41 = vld [vmem:[#allocation5 + $0xc0] sm:$0xff]  ;;  %v1294_v44 = vld [vmem:[#allocation5 + $0x170] sm:$0xff] }
  0x23   :  { %541 = vmatpush.bf16.msra.mxu0 %v1252_v12  ;;  %v227_v38 = vpack.c.b16 %v220_v29, %v220_v29  ;;  %v228_v39 = vpack.c.b16 %v221_v31, %v221_v31  ;;  %v1296_v42 = vld [vmem:[#allocation5 + $0x180] sm:$0xff]  ;;  %v229_v45 = vpack.c.b16 %v222_v37, %v222_v37  ;;  %v230_v46 = vpack.c.b16 %v223_v40, %v223_v40  ;;  %v1285_v47 = vld [vmem:[#allocation5 + $0x128] sm:$0xff]  ;;  %v113_v51 = vld [vmem:[#allocation2 + $0x18] sm:$0xf] }
  0x24   :  { %554 = vmatpush.bf16.msra.mxu1 %v1260_v13  ;;  %v1293_v48 = vld [vmem:[#allocation5 + $0x168] sm:$0xff]  ;;  %v1284_v49 = vld [vmem:[#allocation5 + $0x120] sm:$0xff]  ;;  %v1283_v52 = vld [vmem:[#allocation5 + $0x118] sm:$0xff]  ;;  %v226_v54 = vunpack.c.l.b16 %v113_v51 }
  0x25   :  { %567 = vmatpush.bf16.msra.mxu2 %v1268_v14  ;;  %v1292_v50 = vld [vmem:[#allocation5 + $0x160] sm:$0xff]  ;;  %v1291_v53 = vld [vmem:[#allocation5 + $0x158] sm:$0xff]  ;;  %v1282_v55 = vld [vmem:[#allocation5 + $0x110] sm:$0xff] }
  0x26   :  { %580 = vmatpush.bf16.msra.mxu3 %v1276_v15  ;;  %v1290_v56 = vld [vmem:[#allocation5 + $0x150] sm:$0xff]  ;;  %v233_v57 = vpack.c.b16 %v226_v54, %v226_v54  ;;  %v1281_v58 = vld [vmem:[#allocation5 + $0x108] sm:$0xff]  ;;  %v1280_v63 = vld [vmem:[#allocation5 + $0x100] sm:$0xff] }
  0x27   :  { %542 = vmatpush.bf16.msra.mxu0 %v1251_v16  ;;  %v1289_v59 = vld [vmem:[#allocation5 + $0x148] sm:$0xff]  ;;  %v112_v60 = vld [vmem:[#allocation2 + $0x10] sm:$0xff]  ;;  %v1288_v0 = vld [vmem:[#allocation5 + $0x140] sm:$0xff] }
  0x28   :  { %555 = vmatpush.bf16.msra.mxu1 %v1259_v17  ;;  %v224_v61 = vunpack.c.l.b16 %v112_v60  ;;  %v225_v62 = vunpack.c.h.b16 %v112_v60  ;;  %v1304_v5 = vld [vmem:[#allocation7 + $0x38] sm:$0xff]  ;;  %v1303_v6 = vld [vmem:[#allocation7 + $0x30] sm:$0xff]  ;;  %v1302_v10 = vld [vmem:[#allocation7 + $0x28] sm:$0xff] }
  0x29   :  { %568 = vmatpush.bf16.msra.mxu2 %v1267_v18  ;;  %v1329_v12 = vld [vmem:[%s1587_s2] ss:$0 sm:$0xff]  ;;  %v1301_v13 = vld [vmem:[#allocation7 + $0x20] sm:$0xff]  ;;  %v1299_v18 = vld [vmem:[#allocation7 + $0x10] sm:$0xff] }
  0x2a   :  { %581 = vmatpush.bf16.msra.mxu3 %v1275_v19  ;;  %v231_v1 = vpack.c.b16 %v224_v61, %v224_v61  ;;  %v232_v2 = vpack.c.b16 %v225_v62, %v225_v62  ;;  %v1300_v14 = vld [vmem:[#allocation7 + $0x18] sm:$0xff]  ;;  %v1305_v54 = vld [vmem:[#allocation8] sm:$0xff] }
  0x2b   :  { %543 = vmatpush.bf16.msra.mxu0 %v1250_v20  ;;  %v1298_v20 = vld [vmem:[#allocation7 + $0x8] sm:$0xff]  ;;  %v1308_v51 = vld [vmem:[#allocation8 + $0x18] sm:$0xff] }
  0x2c   :  { %556 = vmatpush.bf16.msra.mxu1 %v1258_v21 }
  0x2d   :  { %569 = vmatpush.bf16.msra.mxu2 %v1266_v22 }
  0x2e   :  { %582 = vmatpush.bf16.msra.mxu3 %v1274_v23  ;;  %v1297_v23 = vld [vmem:[#allocation7] sm:$0xff] }
  0x2f   :  { %544 = vmatpush.bf16.msra.mxu0 %v1249_v24 }
  0x30   :  { %557 = vmatpush.bf16.msra.mxu1 %v1257_v25 }
  0x31   :  { %570 = vmatpush.bf16.msra.mxu2 %v1265_v27 }
  0x32   :  { %583 = vmatpush.bf16.msra.mxu3 %v1273_v30 }
  0x33   :  { %545 = vmatpush.bf16.msra.mxu0 %v1248_v32 }
  0x34   :  { %558 = vmatpush.bf16.msra.mxu1 %v1256_v33 }
  0x35   :  { %571 = vmatpush.bf16.msra.mxu2 %v1264_v36 }
  0x36   :  { %546 = vmatmul.bf16.vlgmr.msra.gmra.mxu0 %v227_v38  ;;  %584 = vmatpush.bf16.msra.mxu3 %v1272_v41 }
  0x37   :  { %590 = vmatpush.bf16.msrb.mxu0 %v1287_v34  ;;  %559 = vmatmul.bf16.vlgmr.msra.gmra.mxu1 %v228_v39 }
  0x38   :  { %603 = vmatpush.bf16.msrb.mxu1 %v1295_v35  ;;  %572 = vmatmul.bf16.vlgmr.msra.gmra.mxu2 %v229_v45 }
  0x39   :  { %623 = vmatpush.bf16.msrb.mxu2 %v1296_v42  ;;  %585 = vmatmul.bf16.vlgmr.msra.gmra.mxu3 %v230_v46 }
  0x3a   :  { %717 = vmatpush.bf16.msrb.mxu3 %v1304_v5 }
  0x3b   :  { %591 = vmatpush.bf16.msrb.mxu0 %v1286_v43 }
  0x3c   :  { %604 = vmatpush.bf16.msrb.mxu1 %v1294_v44 }
  0x3e   :  { %718 = vmatpush.bf16.msrb.mxu3 %v1303_v6 }
  0x3f   :  { %592 = vmatpush.bf16.msrb.mxu0 %v1285_v47  ;;  %v1312_v47 = vld [vmem:[#allocation8 + $0x38] sm:$0xff] }
  0x40   :  { %605 = vmatpush.bf16.msrb.mxu1 %v1293_v48  ;;  %818 = vmatpush.bf16.msra.mxu2 %v1312_v47  ;;  %v1311_v48 = vld [vmem:[#allocation8 + $0x30] sm:$0xff] }
  0x42   :  { %719 = vmatpush.bf16.msrb.mxu3 %v1302_v10  ;;  %v1319_v10 = vld [vmem:[#allocation10 + $0x30] sm:$0xff] }
  0x43   :  { %593 = vmatpush.bf16.msrb.mxu0 %v1284_v49  ;;  %v1310_v49 = vld [vmem:[#allocation8 + $0x28] sm:$0xff] }
  0x44   :  { %606 = vmatpush.bf16.msrb.mxu1 %v1292_v50  ;;  %819 = vmatpush.bf16.msra.mxu2 %v1311_v48  ;;  %v1309_v50 = vld [vmem:[#allocation8 + $0x20] sm:$0xff] }
  0x46   :  { %720 = vmatpush.bf16.msrb.mxu3 %v1301_v13  ;;  %v1316_v13 = vld [vmem:[#allocation10 + $0x18] sm:$0xff] }
  0x47   :  { %594 = vmatpush.bf16.msrb.mxu0 %v1283_v52  ;;  %v1307_v52 = vld [vmem:[#allocation8 + $0x10] sm:$0xff] }
  0x48   :  { %607 = vmatpush.bf16.msrb.mxu1 %v1291_v53  ;;  %1148 = vmatmul.msk.bf16.vlgmr.msrb.gmra.mxu2 %vm534_vm0, %v233_v57  ;;  %v1306_v53 = vld [vmem:[#allocation8 + $0x8] sm:$0xff] }
  0x49   :  { %820 = vmatpush.bf16.msra.mxu2 %v1310_v49 }
  0x4a   :  { %721 = vmatpush.bf16.msrb.mxu3 %v1300_v14  ;;  %v1315_v14 = vld [vmem:[#allocation10 + $0x10] sm:$0xff] }
  0x4b   :  { %595 = vmatpush.bf16.msrb.mxu0 %v1282_v55  ;;  %v1330_v55 = vld [vmem:[%s1589_s4] ss:$0 sm:$0xff] }
  0x4c   :  { %608 = vmatpush.bf16.msrb.mxu1 %v1290_v56 }
  0x4d   :  { %821 = vmatpush.bf16.msra.mxu2 %v1309_v50 }
  0x4e   :  { %722 = vmatpush.bf16.msrb.mxu3 %v1299_v18 }
  0x4f   :  { %596 = vmatpush.bf16.msrb.mxu0 %v1281_v58 }
  0x50   :  { %609 = vmatpush.bf16.msrb.mxu1 %v1289_v59 }
  0x51   :  { %822 = vmatpush.bf16.msra.mxu2 %v1308_v51 }
  0x52   :  { %723 = vmatpush.bf16.msrb.mxu3 %v1298_v20 }
  0x53   :  { %597 = vmatpush.bf16.msrb.mxu0 %v1280_v63 }
  0x54   :  { %610 = vmatpush.bf16.msrb.mxu1 %v1288_v0 }
  0x55   :  { %823 = vmatpush.bf16.msra.mxu2 %v1307_v52 }
  0x56   :  { %598 = vmatmul.bf16.vlgmr.msrb.gmra.mxu0 %v231_v1  ;;  %724 = vmatpush.bf16.msrb.mxu3 %v1297_v23 }
  0x57   :  { %611 = vmatmul.bf16.vlgmr.msrb.gmra.mxu1 %v232_v2 }
  0x59   :  { %824 = vmatpush.bf16.msra.mxu2 %v1306_v53 }
  0x5d   :  { %825 = vmatpush.bf16.msra.mxu2 %v1305_v54 }
  0xb3   :  { %v547_v3 = vpop.f32.mrf.mxu0 }
  0xb4   :  { %v560_v4 = vpop.f32.mrf.mxu1  ;;  %v548_v15 = vadd.f32 %v1329_v12, %v547_v3  ;;  %v1317_v12 = vld [vmem:[#allocation10 + $0x20] sm:$0xff] }
  0xb6   :  { %v561_v19 = vadd.f32 %v560_v4, %v548_v15  ;;  %v1314_v15 = vld [vmem:[#allocation10 + $0x8] sm:$0xff] }
  0xbb   :  { %v549_v7 = vpop.f32.mrf.mxu0  ;;  %v573_v9 = vpop.f32.mrf.mxu2 }
  0xbc   :  { %v562_v8 = vpop.f32.mrf.mxu1  ;;  %v586_v11 = vpop.f32.mrf.mxu3  ;;  %v574_v21 = vadd.f32 %v573_v9, %v561_v19  ;;  %v1320_v9 = vld [vmem:[#allocation10 + $0x38] sm:$0xff] }
  0xbd   :  { %919 = vmatpush.bf16.msra.mxu0 %v1320_v9 }
  0xbe   :  { %v587_v24 = vadd.f32 %v586_v11, %v574_v21  ;;  %v1318_v11 = vld [vmem:[#allocation10 + $0x28] sm:$0xff] }
  0xc1   :  { %920 = vmatpush.bf16.msra.mxu0 %v1319_v10 }
  0xc3   :  { %v575_v16 = vpop.f32.mrf.mxu2 }
  0xc4   :  { %v588_v17 = vpop.f32.mrf.mxu3  ;;  %v1313_v16 = vld [vmem:[#allocation10] sm:$0xff] }
  0xc5   :  { %921 = vmatpush.bf16.msra.mxu0 %v1318_v11  ;;  %v1331_v17 = vld [vmem:[%s1591_s6] ss:$0 sm:$0xff] }
  0xc9   :  { %922 = vmatpush.bf16.msra.mxu0 %v1317_v12 }
  0xcb   :  { %v625_v22 = vpop.f32.mrf.mxu2 }
  0xcd   :  { %923 = vmatpush.bf16.msra.mxu0 %v1316_v13 }
  0xd1   :  { %924 = vmatpush.bf16.msra.mxu0 %v1315_v14 }
  0xd3   :  { %v599_v25 = vpop.f32.mrf.mxu0  ;;  %v627_v29 = vpop.f32.mrf.mxu2 }
  0xd4   :  { %v612_v26 = vpop.f32.mrf.mxu1  ;;  %v600_v27 = vadd.f32 %v599_v25, %v587_v24 }
  0xd5   :  { %925 = vmatpush.bf16.msra.mxu0 %v1314_v15 }
  0xd6   :  { %v613_v28 = vadd.f32 %v612_v26, %v600_v27 }
  0xd8   :  { %v626_v30 = vadd.f32 %v625_v22, %v613_v28 }
  0xd9   :  { %926 = vmatpush.bf16.msra.mxu0 %v1313_v16 }
  0xda   :  { %v1149_v31 = vmul.f32 -1.442695, %v626_v30 }
  0xdb   :  { %v601_v32 = vpop.f32.mrf.mxu0 }
  0xdc   :  { %v614_v33 = vpop.f32.mrf.mxu1  ;;  %1333 = vpow2.f32 %v1149_v31 }
  0xe2   :  { %v1334_v34 = vpop.eup %1333 }
  0xe3   :  { %v632_v35 = vadd.f32 1.0, %v1334_v34 }
  0xe5   :  { %1335 = vrcp.f32 %v632_v35  ;;  %v644_v39 = vand.u32 2147483648, %v632_v35  ;;  %v642_v41 = vand.u32 2147483647, %v632_v35  ;;  %vm638_vm2 = vweird.f32 %v632_v35 }
  0xe7   :  { %v645_v43 = vor.u32 1.1754944e-38, %v644_v39  ;;  %vm643_vm4 = vcmp.eq.f32.partialorder %v642_v41, 8.507059e+37 }
  0xeb   :  { %v1336_v36 = vpop.eup %1335 }
  0xec   :  { %v634_v37 = vmul.f32 %v1336_v36, %v632_v35  ;;  %vm639_vm1 = vweird.f32 %v1336_v36  ;;  %v1332_v35 = vld [vmem:[%s1593_s8] ss:$0 sm:$0xff] }
  0xed   :  { %vm640_vm3 = vmor %vm638_vm2, %vm639_vm1 }
  0xee   :  { %v635_v38 = vsub.f32 1.0, %v634_v37 }
  0xf0   :  { %v636_v40 = vmul.f32 %v1336_v36, %v635_v38 }
  0xf2   :  { %v637_v42 = vadd.f32 %v1336_v36, %v636_v40 }
  0xf4   :  { %v641_v44 = vsel %vm640_vm3, %v1336_v36, %v637_v42 }
  0xf5   :  { %v646_v45 = vsel %vm643_vm4, %v645_v43, %v641_v44 }
  0xf6   :  { %v648_v46 = vpack.c.bf16 %v646_v45, %v646_v45 }
  0xf8   :  { %725 = vmatmul.bf16.vlgmr.msrb.gmra.mxu3 %v648_v46 }
 0x17b   :  { %v726_v56 = vpop.f32.mrf.mxu3 }
 0x17c   :  { %v727_v57 = vadd.f32 %v1330_v55, %v726_v56 }
 0x17e   :  { %v1182_v58 = vmul.f32 -1.442695, %v727_v57 }
 0x180   :  { %1337 = vpow2.f32 %v1182_v58 }
 0x183   :  { %v728_v59 = vpop.f32.mrf.mxu3 }
 0x186   :  { %v1338_v60 = vpop.eup %1337 }
 0x187   :  { %v733_v61 = vadd.f32 1.0, %v1338_v60 }
 0x189   :  { %1339 = vrcp.f32 %v733_v61  ;;  %v745_v1 = vand.u32 2147483648, %v733_v61  ;;  %v743_v3 = vand.u32 2147483647, %v733_v61  ;;  %vm739_vm6 = vweird.f32 %v733_v61 }
 0x18b   :  { %v746_v5 = vor.u32 1.1754944e-38, %v745_v1  ;;  %vm744_vm8 = vcmp.eq.f32.partialorder %v743_v3, 8.507059e+37 }
 0x18f   :  { %v1340_v62 = vpop.eup %1339 }
 0x190   :  { %v735_v63 = vmul.f32 %v1340_v62, %v733_v61  ;;  %vm740_vm5 = vweird.f32 %v1340_v62 }
 0x191   :  { %vm741_vm7 = vmor %vm739_vm6, %vm740_vm5 }
 0x192   :  { %v736_v0 = vsub.f32 1.0, %v735_v63 }
 0x194   :  { %v737_v2 = vmul.f32 %v1340_v62, %v736_v0 }
 0x196   :  { %v738_v4 = vadd.f32 %v1340_v62, %v737_v2 }
 0x198   :  { %v742_v6 = vsel %vm741_vm7, %v1340_v62, %v738_v4 }
 0x199   :  { %v747_v7 = vsel %vm744_vm8, %v746_v5, %v742_v6 }
 0x19a   :  { %v749_v8 = vpack.c.bf16 %v747_v7, %v747_v7 }
 0x19c   :  { %826 = vmatmul.bf16.vlgmr.msra.gmra.mxu2 %v749_v8 }
 0x21f   :  { %v827_v18 = vpop.f32.mrf.mxu2 }
 0x220   :  { %v828_v19 = vadd.f32 %v1331_v17, %v827_v18 }
 0x222   :  { %v1215_v20 = vmul.f32 -1.442695, %v828_v19 }
 0x224   :  { %1341 = vpow2.f32 %v1215_v20 }
 0x227   :  { %v829_v21 = vpop.f32.mrf.mxu2 }
 0x22a   :  { %v1342_v22 = vpop.eup %1341 }
 0x22b   :  { %v834_v23 = vadd.f32 1.0, %v1342_v22 }
 0x22d   :  { %1343 = vrcp.f32 %v834_v23  ;;  %v846_v27 = vand.u32 2147483648, %v834_v23  ;;  %v844_v29 = vand.u32 2147483647, %v834_v23  ;;  %vm840_vm10 = vweird.f32 %v834_v23 }
 0x22f   :  { %v847_v31 = vor.u32 1.1754944e-38, %v846_v27  ;;  %vm845_vm12 = vcmp.eq.f32.partialorder %v844_v29, 8.507059e+37 }
 0x233   :  { %v1344_v24 = vpop.eup %1343 }
 0x234   :  { %v836_v25 = vmul.f32 %v1344_v24, %v834_v23  ;;  %vm841_vm9 = vweird.f32 %v1344_v24 }
 0x235   :  { %vm842_vm11 = vmor %vm840_vm10, %vm841_vm9 }
 0x236   :  { %v837_v26 = vsub.f32 1.0, %v836_v25 }
 0x238   :  { %v838_v28 = vmul.f32 %v1344_v24, %v837_v26 }
 0x23a   :  { %v839_v30 = vadd.f32 %v1344_v24, %v838_v28 }
 0x23c   :  { %v843_v32 = vsel %vm842_vm11, %v1344_v24, %v839_v30 }
 0x23d   :  { %v848_v33 = vsel %vm845_vm12, %v847_v31, %v843_v32 }
 0x23e   :  { %v850_v34 = vpack.c.bf16 %v848_v33, %v848_v33 }
 0x240   :  { %927 = vmatmul.bf16.vlgmr.msra.gmra.mxu0 %v850_v34 }
 0x2bd   :  { %v928_v36 = vpop.f32.mrf.mxu0 }
 0x2be   :  { %v929_v37 = vadd.f32 %v1332_v35, %v928_v36 }
 0x2c0   :  { %932 = vst [vmem:[#allocation11] sm:$0xff] %v929_v37 }
 0x2c1   :  { %943 = dma.vmem_to_hbm [thread:$0]  %s939_s16, 128, %s941_s19, [#allocation4]  }
 0x2c5   :  { %v930_v38 = vpop.f32.mrf.mxu0 }
 0x2c6   :  { %1495 = dma.done.wait [#allocation4], 128  }
 0x2c7   :  { %1496 = vsyncadd [#allocation4], 4294967168 }
 0x2c8   :  { %948 = vsyncpa [#allocation3], 1 }
 0x2c9   :  { %949 = vsyncpa [#allocation6], 1 }
 0x2ca   :  { %950 = vsyncpa [#allocation9], 1 }
 0x2cb   :  { %951 = vsyncpa [#allocation4], 1 }

</bundles_post_ra>
